<compile_context>
chip_gen: v6e
topology: v6e:2x2x1
jax: 0.10.0
libtpu: 0.0.40
codegen_flags: <defaults>
</compile_context>

<pallas_src>
import numpy as np
import jax
import jax.numpy as jnp
from jax.experimental import pallas as pl
from jax.experimental.pallas import tpu as pltpu

MAX_ROW_BLOCK = 8192          # 8192 * 75 * 4 B = 2.4 MiB per f32 block
SMALL_FAST_PATH_BYTES = 1 << 18   # below this, skip Pallas and let XLA fuse


# ----------------------------------------------------------------------------
# Deterministic stand-in for get_mapping_arr(output_format='smplx').
# Entries <= -1 are joints that get filtered out (filter row = 0).
# ----------------------------------------------------------------------------
def get_mapping_arr(output_format="smplx"):
    return np.array(
        [0, 1, 2, 3, 4, 5, 6, 7, -1, 8, 9, 10, 11, 12, -1, 13, 14, 15, 16,
         -1, 17, 18, -1, 19, 20],
        dtype=np.int32,
    )


def build_joint_filter(filter_dims, mapping, threshold=-1, dtype=jnp.float32):
    """Returns (filter_jd, filter_flat_row):
       filter_jd:       (J, D)  -- same semantics as the torch buffer
       filter_flat_row: (1, J*D) -- flattened row for in-kernel broadcast
    """
    mapping = np.asarray(mapping)
    valid = (mapping > threshold).astype(np.float32)                 # (J,)
    filt = np.repeat(valid[:, None], filter_dims, axis=1)            # (J, D)
    flat = filt.reshape(1, -1)                                       # (1, J*D)
    return jnp.asarray(filt, dtype=dtype), jnp.asarray(flat, dtype=dtype)


# ----------------------------------------------------------------------------
# Pallas kernel: elementwise multiply of a (tb, N) batch-row block by a single
# (1, N) filter row that is DMA'd into VMEM once (constant index_map) and
# broadcast over the rows.
# ----------------------------------------------------------------------------
def joint_filter_kernel(x_ref, f_ref, o_ref):
    o_ref[...] = x_ref[...] * f_ref[...]


def _choose_row_block(B):
    """Row block: full B for tiny inputs, else a multiple of 8 giving >=2 grid
    steps (so v7x's two TensorCores both get work), capped at MAX_ROW_BLOCK."""
    if B <= 8:
        return B
    half = (B + 1) // 2
    tb = ((half + 7) // 8) * 8
    return min(tb, MAX_ROW_BLOCK)


def joint_filter_forward(x, filter_flat):
    """x: (B, J, D); filter_flat: (1, J*D), already in x.dtype."""
    B, J, D = x.shape
    N = J * D

    xf = x.reshape(B, N)                      # metadata-only reshape
    tb = _choose_row_block(B)
    grid = (pl.cdiv(B, tb),)

    itemsize = jnp.dtype(x.dtype).itemsize
    cost = pl.CostEstimate(
        flops=B * N,
        bytes_accessed=2 * B * N * itemsize + N * itemsize,
        transcendentals=0,
    )

    out = pl.pallas_call(
        joint_filter_kernel,
        out_shape=jax.ShapeDtypeStruct((B, N), x.dtype),
        grid=grid,
        in_specs=[
            pl.BlockSpec((tb, N), lambda b: (b, 0)),   # last dim = full dim (75)
            pl.BlockSpec((1, N), lambda b: (0, 0)),    # constant index -> DMA'd once
        ],
        out_specs=pl.BlockSpec((tb, N), lambda b: (b, 0)),
        compiler_params=pltpu.CompilerParams(
            dimension_semantics=("parallel",)),        # megacore-shard B on v7x
        cost_estimate=cost,
    )(xf, filter_flat)

    return out.reshape(B, J, D)               # metadata-only reshape


class JointFilter:
    """JAX/Pallas port of the PyTorch JointFilter module."""

    def __init__(self, filter_dims=3, mapping=None, model_type="smplx",
                 dtype=jnp.float32):
        if mapping is None:
            mapping = get_mapping_arr(output_format=model_type)
        self.filter, self._filter_flat = build_joint_filter(
            filter_dims, mapping, threshold=-1, dtype=dtype)
        # per-dtype cache of the flat filter row (avoids a convert per call)
        self._flat_cache = {jnp.dtype(dtype): self._filter_flat}

    def _flat_for(self, dtype):
        dt = jnp.dtype(dtype)
        f = self._flat_cache.get(dt)
        if f is None:
            f = self._filter_flat.astype(dt)
            self._flat_cache[dt] = f
        return f

    def __call__(self, x, force_pallas=False):
        B, J, D = x.shape
        nbytes = B * J * D * jnp.dtype(x.dtype).itemsize
        if nbytes < SMALL_FAST_PATH_BYTES and not force_pallas:
            # Tiny input: the multiply fuses into neighbors for free in XLA;
            # a Pallas launch here is pure overhead.
            return x * self.filter[None, :, :].astype(x.dtype)
        return joint_filter_forward(x, self._flat_for(x.dtype))


if __name__ == "__main__":
    key = jax.random.PRNGKey(0)

    filter_dims = 3
    mapping = get_mapping_arr("smplx")            # 25 joints, deterministic
    B, J, D = 2, len(mapping), filter_dims        # (2, 25, 3)

    module = JointFilter(filter_dims=filter_dims, mapping=mapping)

    # --- check 1: shipped shape via the fused fast path ----------------------
    x = jax.random.normal(key, (B, J, D), dtype=jnp.float32)
    out = jax.block_until_ready(module(x))
    ref = x * module.filter[None, :, :]
    np.testing.assert_allclose(np.asarray(out), np.asarray(ref), rtol=0, atol=0)

    # --- check 2: same small shape but forced through the Pallas kernel ------
    out_k = jax.block_until_ready(module(x, force_pallas=True))
    np.testing.assert_allclose(np.asarray(out_k), np.asarray(ref), rtol=0, atol=0)

    # --- check 3: larger batch -> multi-step grid with a partial last block --
    key2 = jax.random.PRNGKey(0)
    B2 = 1041                                     # tb=528 -> 2 grid steps, last partial
    x2 = jax.random.normal(key2, (B2, J, D), dtype=jnp.float32)
    out2 = jax.block_until_ready(module(x2))
    ref2 = x2 * module.filter[None, :, :]
    np.testing.assert_allclose(np.asarray(out2), np.asarray(ref2), rtol=0, atol=0)

    print("KERNEL_OK")
</pallas_src>

<mosaic_0001>
module attributes {stable_mosaic.version = 11 : i64} {
  func.func @joint_filter_kernel(%arg0: i32, %arg1: memref<2x75xf32, #tpu.memory_space<vmem>>, %arg2: memref<1x75xf32, #tpu.memory_space<vmem>>, %arg3: memref<2x75xf32, #tpu.memory_space<vmem>>) attributes {dimension_semantics = [#tpu.dimension_semantics<parallel>], iteration_bounds = array<i64: 1>, scalar_prefetch = 0 : i64, scratch_operands = 0 : i64, tpu.core_type = #tpu.core_type<tc>, window_params = [{transform_indices = @transform_0, window_bounds = array<i64: 2, 75>}, {pipeline_mode = #tpu.pipeline_mode<synchronous>, transform_indices = @transform_1, window_bounds = array<i64: 1, 75>}, {transform_indices = @transform_2, window_bounds = array<i64: 2, 75>}]} {
    %c0 = arith.constant 0 : index
    %c0_0 = arith.constant 0 : index
    %0 = vector.load %arg1[%c0, %c0_0] : memref<2x75xf32, #tpu.memory_space<vmem>>, vector<2x75xf32>
    %c0_1 = arith.constant 0 : index
    %c0_2 = arith.constant 0 : index
    %1 = vector.load %arg2[%c0_1, %c0_2] : memref<1x75xf32, #tpu.memory_space<vmem>>, vector<1x75xf32>
    %2 = vector.broadcast %1 : vector<1x75xf32> to vector<2x75xf32>
    %3 = arith.mulf %0, %2 : vector<2x75xf32>
    %c0_3 = arith.constant 0 : index
    %c0_4 = arith.constant 0 : index
    %4 = vector.load %arg3[%c0_3, %c0_4] : memref<2x75xf32, #tpu.memory_space<vmem>>, vector<2x75xf32>
    tpu.vector_store %arg3[%c0_3, %c0_4], %3 {strides = array<i32>} : memref<2x75xf32, #tpu.memory_space<vmem>>, vector<2x75xf32>,
    return
  }
  func.func @transform_0(%arg0: i32) -> (i32, i32) {
    %c0_i32 = arith.constant 0 : i32
    %c0_i32_0 = arith.constant 0 : i32
    return %arg0, %c0_i32 : i32, i32
  }
  func.func @transform_1(%arg0: i32) -> (i32, i32) {
    %c0_i32 = arith.constant 0 : i32
    %c0_i32_0 = arith.constant 0 : i32
    %c0_i32_1 = arith.constant 0 : i32
    return %c0_i32, %c0_i32_0 : i32, i32
  }
  func.func @transform_2(%arg0: i32) -> (i32, i32) {
    %c0_i32 = arith.constant 0 : i32
    %c0_i32_0 = arith.constant 0 : i32
    return %arg0, %c0_i32 : i32, i32
  }
}

</mosaic_0001>

<bundles_post_ra>
// kernel: tpu_custom_call.1
= control target key start
LH: loop header
LB: loop body
LE: loop exit
PB: predicated region body
PF: predicated region fallthrough
CT: control target
= control target key end

     0   :  { %7 = vsyncpa [#allocation3], 0  ;;  %s123_s0 = inlined_call_operand.hbm [shape: f32[2,75], index: 0, kind: input, shape index: {}]   ;;  %s124_s1 = inlined_call_operand.vmem [shape: f32[1,75], index: 1, kind: input, shape index: {}]   ;;  %s125_s2 = inlined_call_operand.hbm [shape: f32[2,75], index: 2, kind: output, shape index: {}]  }
   0x1   :  { %8 = vsyncpa [#allocation4], 0  ;;  %s97_s9 = smov [#allocation2]  }
   0x2   :  { %s15_s10 = sshll.u32 %s97_s9, 4  ;;  %s16_s10 = int_to_ptr.vmem [resolvable:$true] %s15_s10 }
   0x3   :  { %s61_s11 = scalar_lea.vmem %s16_s10, 32  ;;  %p66_p1 = scmp.lt.s32.totalorder %s16_s10, %s16_s10 }
   0x4   :  { %p62_p0 = scmp.ne.s32.totalorder %s16_s10, %s61_s11  ;;  %p67_p2 = scmp.lt.s32.totalorder %s61_s11, %s61_s11 }
   0x6   :  { %p68_p3 = por %p67_p2, %p66_p1 }
   0x8   :  { %p69_p4 = pnand %p68_p3, %p62_p0 }
   0xa   :  { %72 = shalt.err (!%p69_p4)
}
   0xb   :  { %18 = dma.hbm_to_vmem [thread:$0]  %s123_s0, 32, %s16_s10, [#allocation3]  }
   0xc   :  { %93 = dma.done.wait [#allocation3], 32  }
   0xd   :  { %94 = vsyncadd [#allocation3], 4294967264  ;;  %s98_s14 = smov [#allocation5]   ;;  %v24_v0 = vld [vmem:[#allocation2] sm:$0x3]  ;;  %vm33_vm0 = vcmask 607232  }
   0xe   :  { %s41_s15 = sshll.u32 %s98_s14, 4  ;;  %v50_v1 = vld [vmem:[%s124_s1] ss:$0 sm:$0xff]  ;;  %s42_s15 = int_to_ptr.vmem [resolvable:$true] %s41_s15 }
   0xf   :  { %v32_v2 = vmul.f32 %v50_v1, %v24_v0  ;;  %s73_s18 = scalar_lea.vmem %s42_s15, 32  ;;  %p78_p6 = scmp.lt.s32.totalorder %s42_s15, %s42_s15 }
  0x10   :  { %p74_p5 = scmp.ne.s32.totalorder %s42_s15, %s73_s18  ;;  %p79_p7 = scmp.lt.s32.totalorder %s73_s18, %s73_s18 }
  0x11   :  { %34 = vst.msk [vmem:[#allocation5] sm:$0x3] %vm33_vm0, %v32_v2 }
  0x12   :  { %p80_p8 = por %p79_p7, %p78_p6 }
  0x14   :  { %p81_p9 = pnand %p80_p8, %p74_p5 }
  0x16   :  { %84 = shalt.err (!%p81_p9)
}
  0x17   :  { %44 = dma.vmem_to_hbm [thread:$0]  %s42_s15, 32, %s125_s2, [#allocation4]  }
  0x18   :  { %95 = dma.done.wait [#allocation4], 32  }
  0x19   :  { %96 = vsyncadd [#allocation4], 4294967264 }
  0x1a   :  { %48 = vsyncpa [#allocation3], 1 }
  0x1b   :  { %49 = vsyncpa [#allocation4], 1 }

</bundles_post_ra>
